<compile_context>
chip_gen: v5e
topology: v5e:2x2
jax: 0.10.0
libtpu: 0.0.40
codegen_flags: <defaults>
</compile_context>

<pallas_src>
import functools

import jax
import jax.numpy as jnp
from jax.experimental import pallas as pl
from jax.experimental.pallas import tpu as pltpu


_VMEM_LIMIT = 48 * 1024 * 1024       # safe ceiling on v7x (64 MiB), v5e/v6e (128 MiB)
_A_STRIP_BUDGET = 24 * 1024 * 1024   # budget for the double-buffered bf16 A row strip


def _round_up(v, m):
    return ((v + m - 1) // m) * m


def _largest_divisor_tile(n, target, step=128):
    """Largest multiple of `step` that divides `n` and is <= max(target, step)."""
    target = max(target, step)
    best = step
    t = step
    while t <= min(n, target):
        if n % t == 0:
            best = t
        t += step
    return best


def _gcn_tiling(n_pad):
    """(tm, tk) for the A_hat tiles of one GCN layer.

    Prefer full-K row strips (tk == n_pad): no K loop, no re-streaming of g.
    tm is as large as the VMEM budget allows (>= 512 at realistic N) while
    keeping >= 2 row blocks for the v7x megacore split when possible.
    """
    max_tm_by_vmem = max(128, _A_STRIP_BUDGET // (n_pad * 2 * 2))   # bf16, 2 bufs
    tm_target = min(1024, max(n_pad // 2, 128), max_tm_by_vmem)
    tm = _largest_divisor_tile(n_pad, tm_target)
    if tm * n_pad * 2 * 2 <= _A_STRIP_BUDGET:
        tk = n_pad                                   # common case: single K block
    else:
        tk = _largest_divisor_tile(n_pad, 2048)      # huge-N fallback, g stays resident
    return tm, tk


# ---------------------------------------------------------------------------
# Kernel 0: row-block projection  g = x @ W   (layer-1 input pre-projection)
# ---------------------------------------------------------------------------
def _project_kernel(x_ref, w_ref, out_ref):
    out_ref[...] = jnp.dot(x_ref[...], w_ref[...],
                           preferred_element_type=jnp.float32).astype(out_ref.dtype)


def project(x, w):
    n_pad, f_in = x.shape
    out_dim = w.shape[1]
    tm = _largest_divisor_tile(n_pad, min(n_pad, 1024))
    grid = (n_pad // tm,)
    return pl.pallas_call(
        _project_kernel,
        out_shape=jax.ShapeDtypeStruct((n_pad, out_dim), jnp.bfloat16),
        grid_spec=pltpu.PrefetchScalarGridSpec(
            num_scalar_prefetch=0,
            grid=grid,
            in_specs=[pl.BlockSpec((tm, f_in), lambda i: (i, 0)),
                      pl.BlockSpec((f_in, out_dim), lambda i: (0, 0))],
            out_specs=pl.BlockSpec((tm, out_dim), lambda i: (i, 0)),
        ),
        compiler_params=pltpu.CompilerParams(
            dimension_semantics=("parallel",),
            vmem_limit_bytes=_VMEM_LIMIT),
        cost_estimate=pl.CostEstimate(
            flops=2 * n_pad * f_in * out_dim, transcendentals=0,
            bytes_accessed=x.size * 2 + w.size * 2 + n_pad * out_dim * 2),
    )(x, w)


# ---------------------------------------------------------------------------
# Kernel 1: one GCN layer,  out = relu(A_hat @ g + b) [ @ W_next ]
# grid = (N/tm row blocks [parallel], N/tk K blocks [arbitrary], usually 1)
# g (pre-projected activations) is fully VMEM resident.
# ---------------------------------------------------------------------------
def _gcn_kernel(*refs, tk, n_pad, with_proj):
    if with_proj:
        a_ref, g_ref, b_ref, w_ref, out_ref, acc_ref = refs
    else:
        a_ref, g_ref, b_ref, out_ref, acc_ref = refs
    k = pl.program_id(1)

    @pl.when(k == 0)
    def _():
        acc_ref[...] = jnp.zeros_like(acc_ref)

    if tk == n_pad:
        g = g_ref[...]
    else:
        g = g_ref[pl.ds(pl.multiple_of(k * tk, 128), tk), :]

    # bf16 x bf16 -> f32 accumulation on the MXU.
    acc_ref[...] += jnp.dot(a_ref[...], g, preferred_element_type=jnp.float32)

    @pl.when(k == pl.num_programs(1) - 1)
    def _():
        h = jnp.maximum(acc_ref[...] + b_ref[...], 0.0)      # f32 bias+ReLU (VPU)
        if with_proj:
            # Fuse the next layer's weight projection; the bf16 cast here is
            # the standard inter-layer downcast (post-bias, post-ReLU).
            out_ref[...] = jnp.dot(h.astype(w_ref.dtype), w_ref[...],
                                   preferred_element_type=jnp.float32
                                   ).astype(out_ref.dtype)
        else:
            out_ref[...] = h.astype(out_ref.dtype)


def gcn_layer(a_hat, g_in, b, w_next=None):
    n_pad = a_hat.shape[0]
    hid = g_in.shape[1]
    tm, tk = _gcn_tiling(n_pad)
    grid = (n_pad // tm, n_pad // tk)
    with_proj = w_next is not None
    out_dim = w_next.shape[1] if with_proj else hid

    in_specs = [
        pl.BlockSpec((tm, tk), lambda i, k: (i, k)),       # A_hat row strip / tile
        pl.BlockSpec((n_pad, hid), lambda i, k: (0, 0)),   # g_in: fully resident
        pl.BlockSpec((1, hid), lambda i, k: (0, 0)),       # bias (f32)
    ]
    args = [a_hat, g_in, b]
    if with_proj:
        in_specs.append(pl.BlockSpec((hid, out_dim), lambda i, k: (0, 0)))  # W_next
        args.append(w_next)

    flops = 2 * n_pad * n_pad * hid + (2 * n_pad * hid * out_dim if with_proj else 0)
    bytes_accessed = (a_hat.size * 2 + g_in.size * 2 + b.size * 4
                      + (w_next.size * 2 if with_proj else 0)
                      + n_pad * out_dim * 2)

    kernel = functools.partial(_gcn_kernel, tk=tk, n_pad=n_pad, with_proj=with_proj)
    return pl.pallas_call(
        kernel,
        out_shape=jax.ShapeDtypeStruct((n_pad, out_dim), jnp.bfloat16),
        grid_spec=pltpu.PrefetchScalarGridSpec(
            num_scalar_prefetch=0,
            grid=grid,
            in_specs=in_specs,
            out_specs=pl.BlockSpec((tm, out_dim), lambda i, k: (i, 0)),
            scratch_shapes=[pltpu.VMEM((tm, hid), jnp.float32)],
        ),
        compiler_params=pltpu.CompilerParams(
            dimension_semantics=("parallel", "arbitrary"),
            vmem_limit_bytes=_VMEM_LIMIT),
        cost_estimate=pl.CostEstimate(flops=flops, transcendentals=0,
                                      bytes_accessed=bytes_accessed),
    )(*args)


# ---------------------------------------------------------------------------
# Kernel 2: global_mean_pool (dense P @ h3) fused with the MLP head:
#   out = relu(P@h3 @ Wm1 + bm1) @ Wm2 + bm2
# tk == n_pad at realistic sizes -> single grid step.
# ---------------------------------------------------------------------------
def _pool_mlp_kernel(p_ref, h_ref, wm1_ref, bm1_ref, wm2_ref, bm2_ref,
                     out_ref, acc_ref):
    k = pl.program_id(0)

    @pl.when(k == 0)
    def _():
        acc_ref[...] = jnp.zeros_like(acc_ref)

    acc_ref[...] += jnp.dot(p_ref[...], h_ref[...],
                            preferred_element_type=jnp.float32)

    @pl.when(k == pl.num_programs(0) - 1)
    def _():
        # Keep the pooled accumulator in f32 through the tiny head matmuls
        # (MLP weights are passed in f32) -- no truncation of the pooled sums.
        y = jnp.maximum(
            jnp.dot(acc_ref[...], wm1_ref[...],
                    preferred_element_type=jnp.float32) + bm1_ref[...], 0.0)
        out_ref[...] = (
            jnp.dot(y, wm2_ref[...], preferred_element_type=jnp.float32)
            + bm2_ref[...])


def pool_mlp(pool, h, wm1, bm1, wm2, bm2):
    b_pad, n_pad = pool.shape
    hid = h.shape[1]
    o_dim = wm2.shape[1]
    max_tk = max(128, _A_STRIP_BUDGET // ((hid + b_pad) * 2 * 2))
    tk = _largest_divisor_tile(n_pad, min(n_pad, max_tk))
    grid = (n_pad // tk,)

    flops = 2 * (b_pad * n_pad * hid + b_pad * hid * hid + b_pad * hid * o_dim)
    bytes_accessed = (pool.size * 2 + h.size * 2 + wm1.size * 4 + wm2.size * 4
                      + bm1.size * 4 + bm2.size * 4 + b_pad * o_dim * 4)

    return pl.pallas_call(
        _pool_mlp_kernel,
        out_shape=jax.ShapeDtypeStruct((b_pad, o_dim), jnp.float32),
        grid_spec=pltpu.PrefetchScalarGridSpec(
            num_scalar_prefetch=0,
            grid=grid,
            in_specs=[
                pl.BlockSpec((b_pad, tk), lambda k: (0, k)),      # pooling strip
                pl.BlockSpec((tk, hid), lambda k: (k, 0)),        # h3 strip
                pl.BlockSpec((hid, hid), lambda k: (0, 0)),       # Wm1 (f32)
                pl.BlockSpec((1, hid), lambda k: (0, 0)),         # bm1
                pl.BlockSpec((hid, o_dim), lambda k: (0, 0)),     # Wm2 (f32)
                pl.BlockSpec((1, o_dim), lambda k: (0, 0)),       # bm2
            ],
            out_specs=pl.BlockSpec((b_pad, o_dim), lambda k: (0, 0)),
            scratch_shapes=[pltpu.VMEM((b_pad, hid), jnp.float32)],
        ),
        compiler_params=pltpu.CompilerParams(
            dimension_semantics=("arbitrary",),
            vmem_limit_bytes=_VMEM_LIMIT),
        cost_estimate=pl.CostEstimate(flops=flops, transcendentals=0,
                                      bytes_accessed=bytes_accessed),
    )(pool, h, wm1, bm1, wm2, bm2)


def gnn_forward(a_hat_pad, x_pad, pool_pad, params):
    """Fused GNN forward on padded inputs; returns padded [B_pad, out] logits."""
    bf = jnp.bfloat16
    a = a_hat_pad.astype(bf)
    p = pool_pad.astype(bf)
    # Layer-1 input pre-projection: g1 = x @ W1 (lane-dense 128 from the start).
    g1 = project(x_pad.astype(bf), params["w1"].astype(bf))
    # Layers 1 & 2 fuse the next layer's weight projection into their finalize.
    g2 = gcn_layer(a, g1, params["b1"], params["w2"].astype(bf))
    g3 = gcn_layer(a, g2, params["b2"], params["w3"].astype(bf))
    h3 = gcn_layer(a, g3, params["b3"])
    return pool_mlp(p, h3, params["wm1"], params["bm1"],
                    params["wm2"], params["bm2"])


# ---------------------------------------------------------------------------
# Plain-JAX glue: dense GCN adjacency / pooling matrices, params, reference.
# (edge_index scatter-add -> dense A_hat has no clean in-kernel equivalent.)
# ---------------------------------------------------------------------------
def build_a_hat(edge_index, num_nodes):
    """Dense GCN-normalized adjacency with self loops: D^-1/2 (A+I) D^-1/2."""
    src, dst = edge_index
    a = jnp.zeros((num_nodes, num_nodes), jnp.float32)
    a = a.at[dst, src].add(1.0)              # A[i, j] = 1 for edge j -> i
    a = a + jnp.eye(num_nodes, dtype=jnp.float32)
    deg = a.sum(axis=1)
    d_inv_sqrt = 1.0 / jnp.sqrt(deg)
    return a * d_inv_sqrt[:, None] * d_inv_sqrt[None, :]


def build_pool(batch, num_graphs):
    """Dense global_mean_pool matrix P: [B, N]."""
    onehot = (batch[None, :] == jnp.arange(num_graphs)[:, None]).astype(jnp.float32)
    counts = jnp.maximum(onehot.sum(axis=1, keepdims=True), 1.0)
    return onehot / counts


def init_params(key, in_features, hidden=128, out_features=256):
    ks = jax.random.split(key, 5)
    scale = 0.1
    return {
        "w1": scale * jax.random.normal(ks[0], (in_features, hidden), jnp.float32),
        "b1": jnp.zeros((1, hidden), jnp.float32),
        "w2": scale * jax.random.normal(ks[1], (hidden, hidden), jnp.float32),
        "b2": jnp.zeros((1, hidden), jnp.float32),
        "w3": scale * jax.random.normal(ks[2], (hidden, hidden), jnp.float32),
        "b3": jnp.zeros((1, hidden), jnp.float32),
        "wm1": scale * jax.random.normal(ks[3], (hidden, hidden), jnp.float32),
        "bm1": jnp.zeros((1, hidden), jnp.float32),
        "wm2": scale * jax.random.normal(ks[4], (hidden, out_features), jnp.float32),
        "bm2": jnp.zeros((1, out_features), jnp.float32),
    }


def gnn_reference(a_hat, x, pool, params):
    """f32 plain-JAX reference (unpadded) for a numerical sanity check."""
    h = x
    for wk, bk in (("w1", "b1"), ("w2", "b2"), ("w3", "b3")):
        h = jnp.maximum((a_hat @ h) @ params[wk] + params[bk], 0.0)
    g = pool @ h
    g = jnp.maximum(g @ params["wm1"] + params["bm1"], 0.0)
    return g @ params["wm2"] + params["bm2"]


if __name__ == "__main__":
    key = jax.random.PRNGKey(0)
    k_x, k_params = jax.random.split(key)

    # Small synthetic batched graph: 2 graphs of 8 nodes each (N=16 total),
    # bidirectional ring edges inside each graph, in_features=32.
    # NOTE: at this toy size everything is a single tile; at realistic N the
    # tiling logic picks 512-1024-row full-K strips and stays HBM-bound.
    in_features = 32
    out_features = 256
    nodes_per_graph = 8
    num_graphs = 2
    N = nodes_per_graph * num_graphs

    src_list, dst_list = [], []
    for g in range(num_graphs):
        base = g * nodes_per_graph
        for i in range(nodes_per_graph):
            j = (i + 1) % nodes_per_graph
            src_list += [base + i, base + j]
            dst_list += [base + j, base + i]
    edge_index = jnp.array([src_list, dst_list], dtype=jnp.int32)   # [2, 32]
    batch = jnp.repeat(jnp.arange(num_graphs, dtype=jnp.int32), nodes_per_graph)

    x = jax.random.normal(k_x, (N, in_features), jnp.float32)       # data.x
    a_hat = build_a_hat(edge_index, N)
    pool = build_pool(batch, num_graphs)
    params = init_params(k_params, in_features, hidden=128,
                         out_features=out_features)

    # Lane/sublane-friendly zero padding: padded rows/cols of A_hat and pool
    # are zero, so real-graph results are unchanged.
    n_pad = max(128, _round_up(N, 128))
    b_pad = max(8, _round_up(num_graphs, 8))
    a_hat_pad = jnp.zeros((n_pad, n_pad), jnp.float32).at[:N, :N].set(a_hat)
    pool_pad = jnp.zeros((b_pad, n_pad), jnp.float32).at[:num_graphs, :N].set(pool)
    x_pad = jnp.zeros((n_pad, in_features), jnp.float32).at[:N].set(x)

    out = gnn_forward(a_hat_pad, x_pad, pool_pad, params)[:num_graphs]
    jax.block_until_ready(out)

    ref = gnn_reference(a_hat, x, pool, params)
    err = float(jnp.max(jnp.abs(out - ref)))
    assert out.shape == (num_graphs, out_features), out.shape
    assert err < 0.25, f"max abs err vs f32 reference too large: {err}"
    print("KERNEL_OK")
</pallas_src>

<mosaic_0001>
module attributes {stable_mosaic.version = 11 : i64} {
  func.func @_project_kernel(%arg0: i32, %arg1: memref<128x32xbf16, #tpu.memory_space<vmem>>, %arg2: memref<32x128xbf16, #tpu.memory_space<vmem>>, %arg3: memref<128x128xbf16, #tpu.memory_space<vmem>>) attributes {dimension_semantics = [#tpu.dimension_semantics<parallel>], iteration_bounds = array<i64: 1>, scalar_prefetch = 0 : i64, scratch_operands = 0 : i64, tpu.core_type = #tpu.core_type<tc>, window_params = [{transform_indices = @transform_0, window_bounds = array<i64: 128, 32>}, {pipeline_mode = #tpu.pipeline_mode<synchronous>, transform_indices = @transform_1, window_bounds = array<i64: 32, 128>}, {transform_indices = @transform_2, window_bounds = array<i64: 128, 128>}]} {
    %c0 = arith.constant 0 : index
    %c0_0 = arith.constant 0 : index
    %0 = vector.load %arg1[%c0, %c0_0] : memref<128x32xbf16, #tpu.memory_space<vmem>>, vector<128x32xbf16>
    %c0_1 = arith.constant 0 : index
    %c0_2 = arith.constant 0 : index
    %1 = vector.load %arg2[%c0_1, %c0_2] : memref<32x128xbf16, #tpu.memory_space<vmem>>, vector<32x128xbf16>
    %cst = arith.constant dense<0.000000e+00> : vector<128x128xf32>
    %2 = tpu.matmul %0, %1, %cst {dimension_numbers = #tpu.dot_dimension_numbers<[1], [0], [0], [1], [0, 0, 1, 1], [], []>} : vector<128x32xbf16>, vector<32x128xbf16>, vector<128x128xf32> -> vector<128x128xf32>
    %3 = arith.truncf %2 : vector<128x128xf32> to vector<128x128xbf16>
    %c0_3 = arith.constant 0 : index
    %c0_4 = arith.constant 0 : index
    %4 = vector.load %arg3[%c0_3, %c0_4] : memref<128x128xbf16, #tpu.memory_space<vmem>>, vector<128x128xbf16>
    tpu.vector_store %arg3[%c0_3, %c0_4], %3 {strides = array<i32>} : memref<128x128xbf16, #tpu.memory_space<vmem>>, vector<128x128xbf16>,
    return
  }
  func.func @transform_0(%arg0: i32) -> (i32, i32) {
    %c0_i32 = arith.constant 0 : i32
    %c0_i32_0 = arith.constant 0 : i32
    return %arg0, %c0_i32 : i32, i32
  }
  func.func @transform_1(%arg0: i32) -> (i32, i32) {
    %c0_i32 = arith.constant 0 : i32
    %c0_i32_0 = arith.constant 0 : i32
    %c0_i32_1 = arith.constant 0 : i32
    return %c0_i32, %c0_i32_0 : i32, i32
  }
  func.func @transform_2(%arg0: i32) -> (i32, i32) {
    %c0_i32 = arith.constant 0 : i32
    %c0_i32_0 = arith.constant 0 : i32
    return %arg0, %c0_i32 : i32, i32
  }
}

</mosaic_0001>

<bundles_post_ra>
// kernel: tpu_custom_call.1
= control target key start
LH: loop header
LB: loop body
LE: loop exit
PB: predicated region body
PF: predicated region fallthrough
CT: control target
= control target key end

     0   :  { %s408_s0 = inlined_call_operand.vmem [shape: bf16[128,32], index: 0, kind: input, shape index: {}]   ;;  %s409_s1 = inlined_call_operand.vmem [shape: bf16[32,128], index: 1, kind: input, shape index: {}]   ;;  %s410_s2 = inlined_call_operand.hbm [shape: bf16[128,128], index: 2, kind: output, shape index: {}]  }
   0x1   :  { %v266_v0 = vld [vmem:[%s409_s1 + $0x8] sm:$0xff]  ;;  %v265_v1 = vld [vmem:[%s409_s1] sm:$0xff] }
   0x2   :  { %116 = vmatpush.bf16.msra.mxu0 %v266_v0  ;;  %314 = vmatpush.bf16.msra.mxu1 %v266_v0 }
   0x3   :  { %315 = vmatpush.bf16.msra.mxu2 %v266_v0  ;;  %316 = vmatpush.bf16.msra.mxu3 %v266_v0 }
   0x4   :  { %7 = vsyncpa [#allocation3], 0  ;;  %v257_v2 = vld [vmem:[%s408_s0] sm:$0xff]  ;;  %v259_v3 = vld [vmem:[%s408_s0 + $0x10] sm:$0xff]  ;;  %vm85_vm0 = vcmask 261120   ;;  %s197_s3 = sshll.u32 %s410_s2, 4  ;;  %s198_s3 = int_to_ptr.hbm [resolvable:$true] %s197_s3 }
   0x5   :  { %v261_v4 = vld [vmem:[%s408_s0 + $0x20] sm:$0xff]  ;;  %v263_v5 = vld [vmem:[%s408_s0 + $0x30] sm:$0xff]  ;;  %v258_v6 = vld [vmem:[%s408_s0 + $0x8] sm:$0xff]  ;;  %s350_s4 = smov 64   ;;  %s351_s5 = smov 4  }
   0x6   :  { %117 = vmatpush.bf16.msra.mxu0 %v265_v1  ;;  %317 = vmatpush.bf16.msra.mxu1 %v265_v1  ;;  %v260_v7 = vld [vmem:[%s408_s0 + $0x18] sm:$0xff]  ;;  %v262_v8 = vld [vmem:[%s408_s0 + $0x28] sm:$0xff] }
   0x7   :  { %318 = vmatpush.bf16.msra.mxu2 %v265_v1  ;;  %319 = vmatpush.bf16.msra.mxu3 %v265_v1  ;;  %v264_v9 = vld [vmem:[%s408_s0 + $0x38] sm:$0xff]  ;;  %s349_s0 = smov [#allocation2]  }
   0x8   :  { %s195_s28 = sshll.u32 %s349_s0, 4  ;;  %s196_s28 = int_to_ptr.vmem [resolvable:$true] %s195_s28 }
   0x9   :  { %249 = vmatmul.msk.bf16.vlgmr.msra.gmra.mxu0 %vm85_vm0, %v257_v2  ;;  %251 = vmatmul.msk.bf16.vlgmr.msra.gmra.mxu1 %vm85_vm0, %v259_v3 }
   0xa   :  { %253 = vmatmul.msk.bf16.vlgmr.msra.gmra.mxu2 %vm85_vm0, %v261_v4  ;;  %255 = vmatmul.msk.bf16.vlgmr.msra.gmra.mxu3 %vm85_vm0, %v263_v5 }
  0x19   :  { %250 = vmatmul.msk.bf16.gmra.mxu0 %vm85_vm0, %v258_v6  ;;  %252 = vmatmul.msk.bf16.gmra.mxu1 %vm85_vm0, %v260_v7 }
  0x1a   :  { %254 = vmatmul.msk.bf16.gmra.mxu2 %vm85_vm0, %v262_v8  ;;  %256 = vmatmul.msk.bf16.gmra.mxu3 %vm85_vm0, %v264_v9 }
  0x86   :  { %v119_v10 = vpop.f32.mrf.mxu0  ;;  %v129_v11 = vpop.f32.mrf.mxu1 }
  0x8d   :  { %v139_v12 = vpop.f32.mrf.mxu2  ;;  %v149_v13 = vpop.f32.mrf.mxu3 }
  0x8e   :  { %v121_v14 = vpop.f32.mrf.mxu0  ;;  %v131_v15 = vpop.f32.mrf.mxu1 }
  0x8f   :  { %v270_v16 = vpack.c.bf16 %v121_v14, %v119_v10  ;;  %v280_v17 = vpack.c.bf16 %v131_v15, %v129_v11 }
  0x91   :  { %271 = vst [vmem:[#allocation2] sm:$0xff] %v270_v16  }
  0x92   :  { %308 = vst [vmem:[#allocation2 + $0x10] sm:$0xff] %v280_v17  }
  0x95   :  { %v141_v18 = vpop.f32.mrf.mxu2  ;;  %v151_v19 = vpop.f32.mrf.mxu3 }
  0x96   :  { %v290_v20 = vpack.c.bf16 %v141_v18, %v139_v12  ;;  %v300_v21 = vpack.c.bf16 %v151_v19, %v149_v13  ;;  %v124_v22 = vpop.f32.mrf.mxu0  ;;  %v134_v23 = vpop.f32.mrf.mxu1 }
  0x98   :  { %310 = vst [vmem:[#allocation2 + $0x20] sm:$0xff] %v290_v20  }
  0x99   :  { %312 = vst [vmem:[#allocation2 + $0x30] sm:$0xff] %v300_v21  }
  0x9d   :  { %v144_v24 = vpop.f32.mrf.mxu2  ;;  %v154_v25 = vpop.f32.mrf.mxu3 }
  0x9e   :  { %v126_v26 = vpop.f32.mrf.mxu0  ;;  %v136_v27 = vpop.f32.mrf.mxu1 }
  0x9f   :  { %v275_v28 = vpack.c.bf16 %v126_v26, %v124_v22  ;;  %v285_v29 = vpack.c.bf16 %v136_v27, %v134_v23 }
  0xa1   :  { %307 = vst [vmem:[#allocation2 + $0x8] sm:$0xff] %v275_v28  }
  0xa2   :  { %309 = vst [vmem:[#allocation2 + $0x18] sm:$0xff] %v285_v29  }
  0xa5   :  { %v146_v30 = vpop.f32.mrf.mxu2  ;;  %v156_v31 = vpop.f32.mrf.mxu3 }
  0xa6   :  { %v295_v32 = vpack.c.bf16 %v146_v30, %v144_v24  ;;  %v305_v33 = vpack.c.bf16 %v156_v31, %v154_v25 }
  0xa8   :  { %311 = vst [vmem:[#allocation2 + $0x28] sm:$0xff] %v295_v32  }
  0xa9   :  { %313 = vst [vmem:[#allocation2 + $0x38] sm:$0xff] %v305_v33  }
  0xaa   :  { %203 = dma.vmem_to_hbm [thread:$0]  %s196_s28, 1024, %s198_s3, [#allocation3], %s350_s4, %s350_s4, %s351_s5  }
  0xab   :  { %347 = dma.done.wait [#allocation3], 1024  }
  0xac   :  { %348 = vsyncadd [#allocation3], 4294966272 }
  0xad   :  { %208 = vsyncpa [#allocation3], 1 }

</bundles_post_ra>
